<compile_context>
chip_gen: v7x
topology: tpu7x:2x2x1
jax: 0.10.0
libtpu: 0.0.40
codegen_flags: <defaults>
</compile_context>

<pallas_src>
import functools

import jax
import jax.numpy as jnp
from jax.experimental import pallas as pl
from jax.experimental.pallas import tpu as pltpu


def _sobel_kernel(x_ref, o_ref, acc_ref, pad_ref, sh_ref, *, in_time, T, H, W):
    # x_ref:   (T, HW)                 one (batch, channel) slice, H*W flat.
    # o_ref:   (T, HW)                 output for this batch sample.
    # acc_ref: (T, HW)                 channel-sum accumulator (f32).
    # pad_ref: (T + 2*pad_t, HW + 2W)  zero-padded (time rows + W-lane border).
    # sh_ref:  (T, HW + 2W)            zero-bordered buffer for vertical shifts.
    HW = H * W
    pad_t = in_time // 2
    c = pl.program_id(1)
    last_c = pl.num_programs(1) - 1

    # ---- channel reduction (grid "arbitrary" axis) --------------------------
    @pl.when(c == 0)
    def _init():
        acc_ref[...] = x_ref[...].astype(jnp.float32)

    @pl.when(c != 0)
    def _accum():
        acc_ref[...] += x_ref[...].astype(jnp.float32)

    # ---- finalize: temporal window + separable 3x3 Sobel --------------------
    @pl.when(c == last_c)
    def _finalize():
        # Move the channel sum into a zero-padded buffer: pad_t rows of
        # temporal zero padding and a W-lane spatial zero border on each side.
        pad_ref[...] = jnp.zeros_like(pad_ref)
        pad_ref[pad_t:pad_t + T, W:W + HW] = acc_ref[...]

        # Temporal sliding-window sum (all in_time taps have weight 1); the
        # zero pad rows reproduce conv3d's temporal zero padding exactly.
        tp = pad_ref[0:T, :]
        for kt in range(1, in_time):
            tp = tp + pad_ref[kt:kt + T, :]          # (T, HW + 2W)

        # Column index along the flattened lane axis (for row-edge masking of
        # the +-1 horizontal shifts).
        col = jnp.mod(jax.lax.broadcasted_iota(jnp.int32, (T, HW), 1), W)

        center = tp[:, W:W + HW]                                    # in[h, w]
        left = jnp.where(col == 0, 0.0, tp[:, W - 1:W - 1 + HW])    # in[h, w-1]
        right = jnp.where(col == W - 1, 0.0, tp[:, W + 1:W + 1 + HW])  # in[h, w+1]

        a = left + center + center + right    # horizontal smooth [1, 2, 1]
        b = left - right                      # horizontal diff   [1, 0, -1]

        # Vertical pass: a +-1 row shift is a +-W lane shift in the flat
        # layout; the W-wide zero borders of sh_ref supply the row-edge zeros.
        sh_ref[...] = jnp.zeros_like(sh_ref)
        sh_ref[:, W:W + HW] = a
        gx = sh_ref[:, 0:HW] - sh_ref[:, 2 * W:2 * W + HW]          # A[h-1]-A[h+1]

        sh_ref[:, W:W + HW] = b                                      # borders stay 0
        gy = sh_ref[:, 0:HW] + b + b + sh_ref[:, 2 * W:2 * W + HW]  # B[h-1]+2B+B[h+1]

        o_ref[...] = (jnp.sqrt(gx * gx + gy * gy) * (1.0 / 3.0)).astype(o_ref.dtype)


def sobel_grad_repeated_2d(im, in_time):
    """im: (N, C, T, H, W). Returns (N, 1, T, H, W) float32."""
    assert in_time % 2 != 0, "in_time must be odd"
    N, C, T, H, W = im.shape
    HW = H * W
    pad_t = in_time // 2

    # Free contiguous reshape: flatten (H, W) onto the lane axis so all blocks
    # are lane-dense (HW = 256 for the 16x16 example).
    x = im.reshape(N, C, T, HW)

    kernel = functools.partial(_sobel_kernel, in_time=in_time, T=T, H=H, W=W)

    out = pl.pallas_call(
        kernel,
        out_shape=jax.ShapeDtypeStruct((N, T, HW), jnp.float32),
        grid_spec=pltpu.PrefetchScalarGridSpec(
            num_scalar_prefetch=0,
            grid=(N, C),                      # channel reduction innermost
            in_specs=[
                pl.BlockSpec((None, None, T, HW), lambda n, c: (n, c, 0, 0)),
            ],
            out_specs=pl.BlockSpec((None, T, HW), lambda n, c: (n, 0, 0)),
            scratch_shapes=[
                pltpu.VMEM((T, HW), jnp.float32),                       # acc
                pltpu.VMEM((T + 2 * pad_t, HW + 2 * W), jnp.float32),   # pad
                pltpu.VMEM((T, HW + 2 * W), jnp.float32),               # shift
            ],
        ),
        compiler_params=pltpu.CompilerParams(
            dimension_semantics=("parallel", "arbitrary")),
    )(x)
    return out.reshape(N, 1, T, H, W)


def _reference(im, in_channels, in_time):
    """Pure-JAX reference mirroring the PyTorch conv3d semantics."""
    gx3 = jnp.array([[1.0, 2.0, 1.0], [0.0, 0.0, 0.0], [-1.0, -2.0, -1.0]],
                    jnp.float32)
    gy3 = gx3.T
    wx = jnp.tile(gx3[None, None, None], (1, in_channels, in_time, 1, 1))
    wy = jnp.tile(gy3[None, None, None], (1, in_channels, in_time, 1, 1))
    dn = jax.lax.conv_dimension_numbers(im.shape, wx.shape,
                                        ("NCDHW", "OIDHW", "NCDHW"))
    pad = [(in_time // 2, in_time // 2), (1, 1), (1, 1)]
    gx = jax.lax.conv_general_dilated(im, wx, (1, 1, 1), pad,
                                      dimension_numbers=dn,
                                      precision=jax.lax.Precision.HIGHEST)
    gy = jax.lax.conv_general_dilated(im, wy, (1, 1, 1), pad,
                                      dimension_numbers=dn,
                                      precision=jax.lax.Precision.HIGHEST)
    return jnp.sqrt(gx * gx + gy * gy) / 3.0


if __name__ == "__main__":
    N, C, T, H, W = 2, 4, 5, 16, 16
    in_time = 5                       # must be odd
    key = jax.random.PRNGKey(0)
    im = jax.random.normal(key, (N, C, T, H, W), dtype=jnp.float32)

    out = jax.block_until_ready(sobel_grad_repeated_2d(im, in_time=in_time))
    ref = jax.block_until_ready(_reference(im, in_channels=C, in_time=in_time))

    assert out.shape == (N, 1, T, H, W)
    assert jnp.allclose(out, ref, rtol=1e-4, atol=1e-4), "mismatch vs reference"

    print("KERNEL_OK")
</pallas_src>

<mosaic_0001>
module attributes {stable_mosaic.version = 11 : i64} {
  func.func @_sobel_kernel(%arg0: i32, %arg1: i32, %arg2: memref<1x1x5x256xf32, #tpu.memory_space<vmem>>, %arg3: memref<1x5x256xf32, #tpu.memory_space<vmem>>, %arg4: memref<5x256xf32, #tpu.memory_space<vmem>>, %arg5: memref<9x288xf32, #tpu.memory_space<vmem>>, %arg6: memref<5x288xf32, #tpu.memory_space<vmem>>) attributes {dimension_semantics = [#tpu.dimension_semantics<parallel>, #tpu.dimension_semantics<arbitrary>], iteration_bounds = array<i64: 2, 4>, scalar_prefetch = 0 : i64, scratch_operands = 3 : i64, tpu.core_type = #tpu.core_type<tc>, window_params = [{transform_indices = @transform_0, window_bounds = array<i64: 1, 1, 5, 256>}, {transform_indices = @transform_1, window_bounds = array<i64: 1, 5, 256>}]} {
    %c0_i32 = arith.constant 0 : i32
    %0 = arith.cmpi eq, %arg1, %c0_i32 : i32
    %1 = arith.extui %0 : i1 to i32
    %c0_i32_0 = arith.constant 0 : i32
    %2 = arith.cmpi ne, %1, %c0_i32_0 : i32
    scf.if %2 {
      %c0 = arith.constant 0 : index
      %c0_4 = arith.constant 0 : index
      %c0_5 = arith.constant 0 : index
      %c0_6 = arith.constant 0 : index
      %9 = vector.load %arg2[%c0, %c0_4, %c0_5, %c0_6] : memref<1x1x5x256xf32, #tpu.memory_space<vmem>>, vector<1x1x5x256xf32>
      %10 = vector.shape_cast %9 : vector<1x1x5x256xf32> to vector<5x256xf32>
      %c0_7 = arith.constant 0 : index
      %c0_8 = arith.constant 0 : index
      %11 = vector.load %arg4[%c0_7, %c0_8] : memref<5x256xf32, #tpu.memory_space<vmem>>, vector<5x256xf32>
      tpu.vector_store %arg4[%c0_7, %c0_8], %10 {strides = array<i32>} : memref<5x256xf32, #tpu.memory_space<vmem>>, vector<5x256xf32>,
    } else {
    }
    %c0_i32_1 = arith.constant 0 : i32
    %3 = arith.cmpi ne, %arg1, %c0_i32_1 : i32
    %4 = arith.extui %3 : i1 to i32
    %c0_i32_2 = arith.constant 0 : i32
    %5 = arith.cmpi ne, %4, %c0_i32_2 : i32
    scf.if %5 {
      %c0 = arith.constant 0 : index
      %c0_4 = arith.constant 0 : index
      %9 = vector.load %arg4[%c0, %c0_4] : memref<5x256xf32, #tpu.memory_space<vmem>>, vector<5x256xf32>
      %c0_5 = arith.constant 0 : index
      %c0_6 = arith.constant 0 : index
      %c0_7 = arith.constant 0 : index
      %c0_8 = arith.constant 0 : index
      %10 = vector.load %arg2[%c0_5, %c0_6, %c0_7, %c0_8] : memref<1x1x5x256xf32, #tpu.memory_space<vmem>>, vector<1x1x5x256xf32>
      %11 = vector.shape_cast %10 : vector<1x1x5x256xf32> to vector<5x256xf32>
      %12 = arith.addf %9, %11 : vector<5x256xf32>
      %c0_9 = arith.constant 0 : index
      %c0_10 = arith.constant 0 : index
      %13 = vector.load %arg4[%c0_9, %c0_10] : memref<5x256xf32, #tpu.memory_space<vmem>>, vector<5x256xf32>
      tpu.vector_store %arg4[%c0_9, %c0_10], %12 {strides = array<i32>} : memref<5x256xf32, #tpu.memory_space<vmem>>, vector<5x256xf32>,
    } else {
    }
    %c3_i32 = arith.constant 3 : i32
    %6 = arith.cmpi eq, %arg1, %c3_i32 : i32
    %7 = arith.extui %6 : i1 to i32
    %c0_i32_3 = arith.constant 0 : i32
    %8 = arith.cmpi ne, %7, %c0_i32_3 : i32
    scf.if %8 {
      %cst = arith.constant 0.000000e+00 : f32
      %9 = vector.broadcast %cst : f32 to vector<9x288xf32>
      %c0 = arith.constant 0 : index
      %c0_4 = arith.constant 0 : index
      %10 = vector.load %arg5[%c0, %c0_4] : memref<9x288xf32, #tpu.memory_space<vmem>>, vector<9x288xf32>
      tpu.vector_store %arg5[%c0, %c0_4], %9 {strides = array<i32>} : memref<9x288xf32, #tpu.memory_space<vmem>>, vector<9x288xf32>,
      %c0_5 = arith.constant 0 : index
      %c0_6 = arith.constant 0 : index
      %11 = vector.load %arg4[%c0_5, %c0_6] : memref<5x256xf32, #tpu.memory_space<vmem>>, vector<5x256xf32>
      %c2 = arith.constant 2 : index
      %c16 = arith.constant 16 : index
      %12 = vector.load %arg5[%c2, %c16] : memref<9x288xf32, #tpu.memory_space<vmem>>, vector<5x256xf32>
      tpu.vector_store %arg5[%c2, %c16], %11 {strides = array<i32>} : memref<9x288xf32, #tpu.memory_space<vmem>>, vector<5x256xf32>,
      %c0_7 = arith.constant 0 : index
      %c0_8 = arith.constant 0 : index
      %13 = vector.load %arg5[%c0_7, %c0_8] : memref<9x288xf32, #tpu.memory_space<vmem>>, vector<5x288xf32>
      %c1 = arith.constant 1 : index
      %c0_9 = arith.constant 0 : index
      %14 = vector.load %arg5[%c1, %c0_9] : memref<9x288xf32, #tpu.memory_space<vmem>>, vector<5x288xf32>
      %15 = arith.addf %13, %14 : vector<5x288xf32>
      %c2_10 = arith.constant 2 : index
      %c0_11 = arith.constant 0 : index
      %16 = vector.load %arg5[%c2_10, %c0_11] : memref<9x288xf32, #tpu.memory_space<vmem>>, vector<5x288xf32>
      %17 = arith.addf %15, %16 : vector<5x288xf32>
      %c3 = arith.constant 3 : index
      %c0_12 = arith.constant 0 : index
      %18 = vector.load %arg5[%c3, %c0_12] : memref<9x288xf32, #tpu.memory_space<vmem>>, vector<5x288xf32>
      %19 = arith.addf %17, %18 : vector<5x288xf32>
      %c4 = arith.constant 4 : index
      %c0_13 = arith.constant 0 : index
      %20 = vector.load %arg5[%c4, %c0_13] : memref<9x288xf32, #tpu.memory_space<vmem>>, vector<5x288xf32>
      %21 = arith.addf %19, %20 : vector<5x288xf32>
      %22 = tpu.iota {dimensions = array<i32: 1>} : vector<5x256xi32>
      %c16_i32 = arith.constant 16 : i32
      %c0_i32_14 = arith.constant 0 : i32
      %23 = arith.cmpi eq, %c16_i32, %c0_i32_14 : i32
      %c1_i32 = arith.constant 1 : i32
      %24 = arith.select %23, %c1_i32, %c16_i32 : i32
      %25 = vector.broadcast %24 : i32 to vector<5x256xi32>
      %26 = arith.remsi %22, %25 : vector<5x256xi32>
      %c0_i32_15 = arith.constant 0 : i32
      %27 = vector.broadcast %c0_i32_15 : i32 to vector<5x256xi32>
      %28 = arith.cmpi ne, %26, %27 : vector<5x256xi32>
      %c0_i32_16 = arith.constant 0 : i32
      %29 = vector.broadcast %c0_i32_16 : i32 to vector<5x256xi32>
      %30 = arith.cmpi slt, %26, %29 : vector<5x256xi32>
      %c0_i32_17 = arith.constant 0 : i32
      %31 = arith.cmpi slt, %24, %c0_i32_17 : i32
      %32 = vector.broadcast %31 : i1 to vector<5x256xi1>
      %33 = vector.broadcast %32 : vector<5x256xi1> to vector<5x256xi1>
      %34 = arith.xori %30, %33 : vector<5x256xi1>
      %35 = arith.andi %34, %28 : vector<5x256xi1>
      %36 = vector.broadcast %24 : i32 to vector<5x256xi32>
      %37 = arith.addi %26, %36 : vector<5x256xi32>
      %38 = arith.select %35, %37, %26 : vector<5x256xi1>, vector<5x256xi32>
      %39 = vector.extract_strided_slice %21 {offsets = [0, 16], sizes = [5, 256], strides = [1, 1]} : vector<5x288xf32> to vector<5x256xf32>
      %c0_i32_18 = arith.constant 0 : i32
      %40 = vector.broadcast %c0_i32_18 : i32 to vector<5x256xi32>
      %41 = arith.cmpi eq, %38, %40 : vector<5x256xi32>
      %42 = vector.extract_strided_slice %21 {offsets = [0, 15], sizes = [5, 256], strides = [1, 1]} : vector<5x288xf32> to vector<5x256xf32>
      %cst_19 = arith.constant 0.000000e+00 : f32
      %43 = vector.broadcast %cst_19 : f32 to vector<5x256xf32>
      %44 = arith.select %41, %43, %42 : vector<5x256xi1>, vector<5x256xf32>
      %c15_i32 = arith.constant 15 : i32
      %45 = vector.broadcast %c15_i32 : i32 to vector<5x256xi32>
      %46 = arith.cmpi eq, %38, %45 : vector<5x256xi32>
      %47 = vector.extract_strided_slice %21 {offsets = [0, 17], sizes = [5, 256], strides = [1, 1]} : vector<5x288xf32> to vector<5x256xf32>
      %cst_20 = arith.constant 0.000000e+00 : f32
      %48 = vector.broadcast %cst_20 : f32 to vector<5x256xf32>
      %49 = arith.select %46, %48, %47 : vector<5x256xi1>, vector<5x256xf32>
      %50 = arith.addf %44, %39 : vector<5x256xf32>
      %51 = arith.addf %50, %39 : vector<5x256xf32>
      %52 = arith.addf %51, %49 : vector<5x256xf32>
      %53 = arith.subf %44, %49 : vector<5x256xf32>
      %cst_21 = arith.constant 0.000000e+00 : f32
      %54 = vector.broadcast %cst_21 : f32 to vector<5x288xf32>
      %c0_22 = arith.constant 0 : index
      %c0_23 = arith.constant 0 : index
      %55 = vector.load %arg6[%c0_22, %c0_23] : memref<5x288xf32, #tpu.memory_space<vmem>>, vector<5x288xf32>
      tpu.vector_store %arg6[%c0_22, %c0_23], %54 {strides = array<i32>} : memref<5x288xf32, #tpu.memory_space<vmem>>, vector<5x288xf32>,
      %c0_24 = arith.constant 0 : index
      %c16_25 = arith.constant 16 : index
      %56 = vector.load %arg6[%c0_24, %c16_25] : memref<5x288xf32, #tpu.memory_space<vmem>>, vector<5x256xf32>
      tpu.vector_store %arg6[%c0_24, %c16_25], %52 {strides = array<i32>} : memref<5x288xf32, #tpu.memory_space<vmem>>, vector<5x256xf32>,
      %c0_26 = arith.constant 0 : index
      %c0_27 = arith.constant 0 : index
      %57 = vector.load %arg6[%c0_26, %c0_27] : memref<5x288xf32, #tpu.memory_space<vmem>>, vector<5x256xf32>
      %c0_28 = arith.constant 0 : index
      %c32 = arith.constant 32 : index
      %58 = vector.load %arg6[%c0_28, %c32] : memref<5x288xf32, #tpu.memory_space<vmem>>, vector<5x256xf32>
      %59 = arith.subf %57, %58 : vector<5x256xf32>
      %c0_29 = arith.constant 0 : index
      %c16_30 = arith.constant 16 : index
      %60 = vector.load %arg6[%c0_29, %c16_30] : memref<5x288xf32, #tpu.memory_space<vmem>>, vector<5x256xf32>
      tpu.vector_store %arg6[%c0_29, %c16_30], %53 {strides = array<i32>} : memref<5x288xf32, #tpu.memory_space<vmem>>, vector<5x256xf32>,
      %c0_31 = arith.constant 0 : index
      %c0_32 = arith.constant 0 : index
      %61 = vector.load %arg6[%c0_31, %c0_32] : memref<5x288xf32, #tpu.memory_space<vmem>>, vector<5x256xf32>
      %62 = arith.addf %61, %53 : vector<5x256xf32>
      %63 = arith.addf %62, %53 : vector<5x256xf32>
      %c0_33 = arith.constant 0 : index
      %c32_34 = arith.constant 32 : index
      %64 = vector.load %arg6[%c0_33, %c32_34] : memref<5x288xf32, #tpu.memory_space<vmem>>, vector<5x256xf32>
      %65 = arith.addf %63, %64 : vector<5x256xf32>
      %66 = arith.mulf %59, %59 : vector<5x256xf32>
      %67 = arith.mulf %65, %65 : vector<5x256xf32>
      %68 = arith.addf %66, %67 : vector<5x256xf32>
      %69 = math.sqrt %68 : vector<5x256xf32>
      %cst_35 = arith.constant 0.333333343 : f32
      %70 = vector.broadcast %cst_35 : f32 to vector<5x256xf32>
      %71 = arith.mulf %69, %70 : vector<5x256xf32>
      %c0_36 = arith.constant 0 : index
      %c0_37 = arith.constant 0 : index
      %c0_38 = arith.constant 0 : index
      %72 = vector.load %arg3[%c0_36, %c0_37, %c0_38] : memref<1x5x256xf32, #tpu.memory_space<vmem>>, vector<1x5x256xf32>
      %73 = vector.shape_cast %72 : vector<1x5x256xf32> to vector<5x256xf32>
      %74 = vector.shape_cast %71 : vector<5x256xf32> to vector<1x5x256xf32>
      tpu.vector_store %arg3[%c0_36, %c0_37, %c0_38], %74 {strides = array<i32>} : memref<1x5x256xf32, #tpu.memory_space<vmem>>, vector<1x5x256xf32>,
    } else {
    }
    return
  }
  func.func @transform_0(%arg0: i32, %arg1: i32) -> (i32, i32, i32, i32) {
    %c0_i32 = arith.constant 0 : i32
    %c0_i32_0 = arith.constant 0 : i32
    %c0_i32_1 = arith.constant 0 : i32
    return %arg0, %arg1, %c0_i32, %c0_i32_0 : i32, i32, i32, i32
  }
  func.func @transform_1(%arg0: i32, %arg1: i32) -> (i32, i32, i32) {
    %c0_i32 = arith.constant 0 : i32
    %c0_i32_0 = arith.constant 0 : i32
    %c0_i32_1 = arith.constant 0 : i32
    return %arg0, %c0_i32, %c0_i32_0 : i32, i32, i32
  }
}

</mosaic_0001>

<bundles_post_ra>
// kernel: tpu_custom_call.1
= control target key start
LH: loop header
LB: loop body
LE: loop exit
PB: predicated region body
PF: predicated region fallthrough
CT: control target
= control target key end

     0   :  { %s644_s6 = smov 0   ;;  %s646_s7 = smov 0   ;;  %s733_s0 = inlined_call_operand.vmem [shape: f32[2,4,5,256], index: 0, kind: input, shape index: {}]   ;;  %s734_s1 = inlined_call_operand.vmem [shape: f32[2,5,256], index: 1, kind: output, shape index: {}]  }
   0x1   :  { %s648_s8 = smov 0   ;;  %s650_s9 = smov 0  }
   0x2   :  { %s652_s10 = smov 0  }
   0x3 LB: > { %s20_s11 = sadd.s32 1, %s618_s8  ;;  %s23_s12 = sadd.s32 1, %s622_s9  ;;  %s626_s10 = sphi %s652_s10, %s11_s10   ;;  %s622_s9 = sphi %s650_s9, %s738_s9   ;;  %s618_s8 = sphi %s648_s8, %s737_s8   ;;  %s614_s7 = sphi %s646_s7, %s736_s7   ;;  %s610_s6 = sphi %s644_s6, %s735_s6  }
   0x4   : > { %p21_p0 = scmp.ge.s32.totalorder %s20_s11, 4  ;;  %p526_p1 = scmp.ge.s32.totalorder %s626_s10, 1 }
   0x5   : > { %p105_p2 = scmp.lt.s32.totalorder %s626_s10, 9 }
   0x6   : > { %s740_s11 = smov (%p21_p0, %s20_s11), 0  ;;  %s742_s12 = smov (!%p21_p0, %s23_s12), %s622_s9 }
   0x7   : > { %p106_p3 = pnand %p526_p1, %p105_p2  ;;  %p25_p4 = scmp.ge.s32.totalorder %s742_s12, 2 }
   0x8   : > { %p129_p5 = scmp.lt.s32.totalorder (!%p106_p3), %s614_s7, 1  ;;  %p131_p6 = scmp.lt.s32.totalorder (!%p106_p3), %s610_s6, 3 }
   0x9   : > { %s744_s12 = smov (%p25_p4, %s742_s12), 0  ;;  %109 = sbr.rel (%p106_p3) target bundleno = 589 (0x24d), region = 24 }
   0xa   : > { %p532_p7 = scmp.ne.s32.totalorder (!%p106_p3), %s610_s6, 0 }
  0x10   : > { %s746_s7 = smov (!%p129_p5, %s614_s7), 1  ;;  %146 = sbr.rel (%p532_p7) target bundleno = 25 (0x19), region = 28 }
  0x11   : > { %s132_s13 = scalar_select %p131_p6, %s610_s6, 3 }
  0x12   : > { %s528_s14 = sshll.u32 %s746_s7, 3  ;;  %s537_s15 = sshll.u32 %s746_s7, 4 }
  0x13   : > { %s527_s16 = sshll.u32 %s132_s13, 1  ;;  %s681_s19 = scalar_lea.vmem %s734_s1, %s537_s15 }
  0x14   : > { %s135_s20 = sadd.s32 %s528_s14, %s527_s16 }
  0x15   : > { %s529_s21 = sshll.u32 %s135_s20, 3 }
  0x16   : > { %s137_s24 = scalar_lea.vmem %s733_s0, %s529_s21 }
  0x17   : > { %v147_v0 = vld [vmem:[%s137_s24] sm:$0x1f]  ;;  %v148_v1 = vld [vmem:[%s137_s24 + $0x8] sm:$0x1f] }
  0x18   : > { %149 = vst [vmem:[#allocation2] sm:$0x1f] %v147_v0  ;;  %150 = vst [vmem:[#allocation2 + $0x8] sm:$0x1f] %v148_v1 }
  0x19 PF: > { %p533_p8 = scmp.eq.s32.totalorder %s610_s6, 0 }
  0x1a   : > { %v157_v3 = vld [vmem:[%s137_s24] sm:$0x1f] (!%p533_p8)  ;;  %v158_v6 = vld [vmem:[%s137_s24 + $0x8] sm:$0x1f] (!%p533_p8) }
  0x1b   : > { %154 = sbr.rel (%p533_p8) target bundleno = 35 (0x23), region = 32 }
  0x1f   : > { %v155_v2 = vld [vmem:[#allocation2] sm:$0x1f] (!%p533_p8)  ;;  %v156_v4 = vld [vmem:[#allocation2 + $0x8] sm:$0x1f] (!%p533_p8) }
  0x20   : > { %v159_v5 = vadd.f32 (!%p533_p8), %v157_v3, %v155_v2  ;;  %v160_v7 = vadd.f32 (!%p533_p8), %v158_v6, %v156_v4 }
  0x22   : > { %161 = vst [vmem:[#allocation2] sm:$0x1f] %v159_v5  ;;  %162 = vst [vmem:[#allocation2 + $0x8] sm:$0x1f] %v160_v7 }
  0x23 PF: > { %p534_p9 = scmp.ne.s32.totalorder %s610_s6, 3 }
  0x24   : > { %v628_v11 = vmov (!%p534_p9), 0.0   ;;  %vm169_vm0 = vcmask (!%p534_p9), 261120   ;;  %vm173_vm1 = vcmask (!%p534_p9), 253952   ;;  %s629_s25 = smov (!%p534_p9), 16   ;;  %vm190_vm2 = vcmask (!%p534_p9), 1046658   ;;  %s630_s26 = smov (!%p534_p9), 113  }
  0x25   : > { %166 = sbr.rel (%p534_p9) target bundleno = 589 (0x24d), region = 36  ;;  %167 = vst [vmem:[#allocation3] sm:$0xff] (!%p534_p9), %v628_v11  ;;  %168 = vst [vmem:[#allocation3 + $0x8] sm:$0xff] (!%p534_p9), %v628_v11  ;;  %vm185_vm3 = vcmask (!%p534_p9), 130048   ;;  %vm193_vm4 = vcmask (!%p534_p9), 129026   ;;  %vm255_vm5 = vcmask (!%p534_p9), 1043456   ;;  %v271_v0 = vlaneseq (!%p534_p9) }
  0x26   : > { %171 = vst [vmem:[#allocation3 + $0x18] sm:$0x1] (!%p534_p9), %v628_v11  ;;  %172 = vst [vmem:[#allocation3 + $0x20] sm:$0x1] (!%p534_p9), %v628_v11  ;;  %s631_s27 = smov (!%p534_p9), 112   ;;  %s632_s28 = smov (!%p534_p9), 111  }
  0x27   : > { %350 = vst [vmem:[#allocation4] sm:$0x1f] (!%p534_p9), %v628_v11  ;;  %351 = vst [vmem:[#allocation4 + $0x8] sm:$0x1f] (!%p534_p9), %v628_v11  ;;  %vm352_vm6 = vcmask (!%p534_p9), 258048   ;;  %v272_v1 = vand.u32 (!%p534_p9), 127, %v271_v0 }
  0x28   : > { %170 = vst.msk [vmem:[#allocation3 + $0x10] sm:$0xff] (!%p534_p9), %vm169_vm0, %v628_v11  ;;  %vm337_vm7 = vcmask (!%p534_p9), 916480   ;;  %vm309_vm8 = vcmask (!%p534_p9), 924672   ;;  %vm324_vm11 = vcmask (!%p534_p9), 908288   ;;  %vm367_vm14 = vcmask (!%p534_p9), 126976   ;;  %s633_s29 = smov (!%p534_p9), 96  }
  0x29   : > { %v175_v8 = vld [vmem:[#allocation2] sm:$0x1f] (!%p534_p9)  ;;  %v176_v9 = vld [vmem:[#allocation2 + $0x8] sm:$0x1f] (!%p534_p9)  ;;  %174 = vst.msk [vmem:[#allocation3 + $0x28] sm:$0x1] (!%p534_p9), %vm173_vm1, %v628_v11 }
  0x2a   : > { %v179_v10 = vrot.slane (!%p534_p9), %v175_v8, 6  ;;  %v180_v12 = vrot.slane (!%p534_p9), %v176_v9, 6  ;;  %353 = vst.msk [vmem:[#allocation4 + $0x10] sm:$0x1f] (!%p534_p9), %vm352_vm6, %v628_v11  ;;  %v273_v3 = vadd.s32 (!%p534_p9), 128, %v272_v1  ;;  %v278_v6 = vand.u32 (!%p534_p9), 15, %v272_v1 }
  0x2b   : > { %vm364_vm15 = vcmask (!%p534_p9), 1044608   ;;  %vm381_vm0 = vcmask (!%p534_p9), 785408  }
  0x2c   : > { %181 = vrot.lane.b32.xlu0 %v179_v10, %s629_s25  ;;  %v285_v7 = vand.u32 15, %v273_v3  ;;  %vm298_vm9 = vcmp.eq.s32.totalorder %v278_v6, 0  ;;  %vm316_vm12 = vcmp.eq.s32.totalorder %v278_v6, 15 }
  0x2d   : > { %v246_v18 = vld [vmem:[#allocation3 + $0x18] sm:$0x1]  ;;  %v247_v57 = vld [vmem:[#allocation3 + $0x20] sm:$0x1] }
  0x2e   : > { %v257_v26 = vrot.slane %v246_v18, 4  ;;  %v260_v60 = vrot.slane %v247_v57, 4  ;;  %vm299_vm10 = vcmp.eq.s32.totalorder %v285_v7, 0  ;;  %vm317_vm13 = vcmp.eq.s32.totalorder %v285_v7, 15 }
  0x30   : > { %183 = vrot.lane.b32.xlu0 %v180_v12, %s629_s25  ;;  %v248_v27 = vld [vmem:[#allocation3 + $0x28] sm:$0x1] }
  0x31   : > { %v263_v43 = vrot.slane %v248_v27, 4 }
  0x9e   : > { %v182_v13 = vpop.permute.xlu0 %181 }
  0x9f   : > { %191 = vst.msk [vmem:[#allocation3] sm:$0x7c] %vm190_vm2, %v182_v13 }
  0xa2   : > { %v184_v14 = vpop.permute.xlu0 %183 }
  0xa3   : > { %v186_v15 = vsel %vm185_vm3, %v182_v13, %v184_v14  ;;  %194 = vst.msk [vmem:[#allocation3 + $0x10] sm:$0x7c] %vm193_vm4, %v184_v14 }
  0xa4   : > { %192 = vst [vmem:[#allocation3 + $0x8] sm:$0x7c] %v186_v15 }
  0xa6   : > { %v198_v16 = vld [vmem:[#allocation3] sm:$0x3e] }
  0xa7   : > { %v213_v17 = vld [vmem:[#allocation3] sm:$0x7c]  ;;  %v204_v19 = vrot.slane %v198_v16, 1 }
  0xa8   : > { %v243_v20 = vld [vmem:[#allocation3] sm:$0xf0]  ;;  %v219_v24 = vrot.slane %v213_v17, 2 }
  0xa9   : > { %v195_v21 = vld [vmem:[#allocation3] sm:$0x1f]  ;;  %v256_v25 = vrot.slane %v243_v20, 4 }
  0xaa   : > { %v228_v22 = vld [vmem:[#allocation3] sm:$0xf8]  ;;  %v210_v23 = vadd.f32 %v204_v19, %v195_v21  ;;  %v197_v28 = vld [vmem:[#allocation3 + $0x10] sm:$0x1f] }
  0xab   : > { %v200_v29 = vld [vmem:[#allocation3 + $0x10] sm:$0x3e]  ;;  %v234_v32 = vrot.slane %v228_v22, 3  ;;  %v199_v37 = vld [vmem:[#allocation3 + $0x8] sm:$0x3e]  ;;  %v258_v41 = vsel %vm255_vm5, %v256_v25, %v257_v26 }
  0xac   : > { %v215_v30 = vld [vmem:[#allocation3 + $0x10] sm:$0x7c]  ;;  %v225_v31 = vadd.f32 %v219_v24, %v210_v23  ;;  %v206_v33 = vrot.slane %v200_v29, 1  ;;  %v205_v40 = vrot.slane %v199_v37, 1  ;;  %v196_v44 = vld [vmem:[#allocation3 + $0x8] sm:$0x1f] }
  0xad   : > { %v221_v34 = vrot.slane %v215_v30, 2  ;;  %v245_v35 = vld [vmem:[#allocation3 + $0x10] sm:$0xf0]  ;;  %v214_v45 = vld [vmem:[#allocation3 + $0x8] sm:$0x7c] }
  0xae   : > { %v230_v36 = vld [vmem:[#allocation3 + $0x10] sm:$0xf8]  ;;  %v240_v38 = vadd.f32 %v234_v32, %v225_v31  ;;  %v212_v39 = vadd.f32 %v206_v33, %v197_v28  ;;  %v262_v42 = vrot.slane %v245_v35, 4  ;;  %v211_v49 = vadd.f32 %v205_v40, %v196_v44  ;;  %v229_v53 = vld [vmem:[#allocation3 + $0x8] sm:$0xf8] }
  0xaf   : > { %v236_v48 = vrot.slane %v230_v36, 3  ;;  %v220_v51 = vrot.slane %v214_v45, 2  ;;  %v244_v56 = vld [vmem:[#allocation3 + $0x8] sm:$0xf0]  ;;  %v235_v58 = vrot.slane %v229_v53, 3 }
  0xb0   : > { %v268_v46 = vadd.f32 %v258_v41, %v240_v38  ;;  %v227_v47 = vadd.f32 %v221_v34, %v212_v39  ;;  %v264_v52 = vsel %vm255_vm5, %v262_v42, %v263_v43  ;;  %v259_v59 = vrot.slane %v244_v56, 4 }
  0xb1   : > { %v226_v55 = vadd.f32 %v220_v51, %v211_v49 }
  0xb2   : > { %303 = vrot.lane.b32.xlu1 %v268_v46, %s630_s26  ;;  %v242_v50 = vadd.f32 %v236_v48, %v227_v47  ;;  %v261_v62 = vsel %vm255_vm5, %v259_v59, %v260_v60 }
  0xb3   : > { %v241_v61 = vadd.f32 %v235_v58, %v226_v55 }
  0xb4   : > { %v270_v54 = vadd.f32 %v264_v52, %v242_v50 }
  0xb5   : > { %v269_v63 = vadd.f32 %v261_v62, %v241_v61 }
  0xb6   : > { %307 = vrot.lane.b32.xlu0 %v270_v54, %s630_s26  ;;  %331 = vrot.lane.b32.xlu1 %v268_v46, %s631_s27 }
  0xba   : > { %318 = vrot.lane.b32.xlu0 %v268_v46, %s632_s28  ;;  %335 = vrot.lane.b32.xlu1 %v270_v54, %s631_s27 }
  0xbe   : > { %333 = vrot.lane.b32.xlu0 %v269_v63, %s631_s27  ;;  %305 = vrot.lane.b32.xlu1 %v269_v63, %s630_s26 }
  0xc2   : > { %322 = vrot.lane.b32.xlu0 %v270_v54, %s632_s28  ;;  %320 = vrot.lane.b32.xlu1 %v269_v63, %s632_s28 }
 0x124   : > { %v304_v2 = vpop.permute.xlu1 %303 }
 0x128   : > { %v308_v4 = vpop.permute.xlu0 %307  ;;  %v332_v5 = vpop.permute.xlu1 %331 }
 0x12c   : > { %v319_v8 = vpop.permute.xlu0 %318  ;;  %v336_v9 = vpop.permute.xlu1 %335 }
 0x130   : > { %v334_v10 = vpop.permute.xlu0 %333  ;;  %v306_v12 = vpop.permute.xlu1 %305 }
 0x131   : > { %v338_v13 = vsel %vm337_vm7, %v332_v5, %v334_v10  ;;  %v339_v11 = vsel %vm337_vm7, %v334_v10, %v336_v9  ;;  %v310_v14 = vsel %vm309_vm8, %v304_v2, %v306_v12  ;;  %v311_v15 = vsel %vm309_vm8, %v306_v12, %v308_v4 }
 0x132   : > { %v314_v16 = vsel %vm298_vm9, 0.0, %v310_v14  ;;  %v315_v17 = vsel %vm299_vm10, 0.0, %v311_v15 }
 0x133   : > { %v342_v18 = vadd.f32 %v338_v13, %v314_v16  ;;  %v343_v19 = vadd.f32 %v339_v11, %v315_v17 }
 0x134   : > { %v323_v20 = vpop.permute.xlu0 %322  ;;  %v321_v21 = vpop.permute.xlu1 %320 }
 0x135   : > { %v344_v22 = vadd.f32 %v342_v18, %v338_v13  ;;  %v345_v23 = vadd.f32 %v343_v19, %v339_v11  ;;  %v325_v24 = vsel %vm324_vm11, %v319_v8, %v321_v21  ;;  %v326_v25 = vsel %vm324_vm11, %v321_v21, %v323_v20 }
 0x136   : > { %v329_v26 = vsel %vm316_vm12, 0.0, %v325_v24  ;;  %v330_v27 = vsel %vm317_vm13, 0.0, %v326_v25 }
 0x137   : > { %v346_v28 = vadd.f32 %v344_v22, %v329_v26  ;;  %v347_v29 = vadd.f32 %v345_v23, %v330_v27  ;;  %v348_v30 = vsub.f32 %v314_v16, %v329_v26  ;;  %v349_v31 = vsub.f32 %v315_v17, %v330_v27 }
 0x139   : > { %358 = vrot.lane.b32.xlu0 %v347_v29, %s629_s25  ;;  %356 = vrot.lane.b32.xlu1 %v346_v28, %s629_s25 }
 0x13d   : > { %392 = vrot.lane.b32.xlu0 %v349_v31, %s629_s25  ;;  %390 = vrot.lane.b32.xlu1 %v348_v30, %s629_s25 }
 0x1ab   : > { %v359_v32 = vpop.permute.xlu0 %358  ;;  %v357_v33 = vpop.permute.xlu1 %356 }
 0x1ac   : > { %368 = vst.msk [vmem:[#allocation4 + $0x10] sm:$0x1f] %vm367_vm14, %v359_v32  ;;  %v360_v34 = vsel %vm185_vm3, %v357_v33, %v359_v32 }
 0x1ad   : > { %365 = vst.msk [vmem:[#allocation4] sm:$0x1f] %vm364_vm15, %v357_v33  ;;  %366 = vst [vmem:[#allocation4 + $0x8] sm:$0x1f] %v360_v34 }
 0x1af   : > { %v393_v35 = vpop.permute.xlu0 %392  ;;  %v391_v36 = vpop.permute.xlu1 %390 }
 0x1b0   : > { %v394_v39 = vsel %vm185_vm3, %v391_v36, %v393_v35 }
 0x1b3   : > { %v371_v38 = vld [vmem:[#allocation4 + $0x10] sm:$0x1f] }
 0x1b4   : > { %v369_v37 = vld [vmem:[#allocation4] sm:$0x1f]  ;;  %v370_v40 = vld [vmem:[#allocation4 + $0x8] sm:$0x1f]  ;;  %400 = vst.msk [vmem:[#allocation4 + $0x10] sm:$0x1f] %vm367_vm14, %v393_v35 }
 0x1b5   : > { %375 = vrot.lane.b32.xlu1 %v369_v37, %s633_s29  ;;  %398 = vst.msk [vmem:[#allocation4] sm:$0x1f] %vm364_vm15, %v391_v36  ;;  %377 = vrot.lane.b32.xlu0 %v370_v40, %s633_s29  ;;  %399 = vst [vmem:[#allocation4 + $0x8] sm:$0x1f] %v394_v39 }
 0x1b9   : > { %379 = vrot.lane.b32.xlu1 %v371_v38, %s633_s29 }
 0x1bb   : > { %v407_v43 = vld [vmem:[#allocation4 + $0x10] sm:$0x1f] }
 0x1bc   : > { %v401_v41 = vld [vmem:[#allocation4] sm:$0x1f]  ;;  %v402_v42 = vld [vmem:[#allocation4 + $0x8] sm:$0x1f] }
 0x1bd   : > { %411 = vrot.lane.b32.xlu0 %v401_v41, %s633_s29  ;;  %413 = vrot.lane.b32.xlu1 %v402_v42, %s633_s29  ;;  %v403_v47 = vadd.f32 %v401_v41, %v348_v30  ;;  %v404_v49 = vadd.f32 %v402_v42, %v349_v31 }
 0x1bf   : > { %v405_v53 = vadd.f32 %v403_v47, %v348_v30  ;;  %v406_v59 = vadd.f32 %v404_v49, %v349_v31 }
 0x1c1   : > { %415 = vrot.lane.b32.xlu0 %v407_v43, %s633_s29 }
 0x227   : > { %v376_v44 = vpop.permute.xlu1 %375  ;;  %v378_v45 = vpop.permute.xlu0 %377 }
 0x228   : > { %v382_v48 = vsel %vm381_vm0, %v376_v44, %v378_v45 }
 0x229   : > { %v386_v51 = vsub.f32 %v369_v37, %v382_v48 }
 0x22b   : > { %v380_v46 = vpop.permute.xlu1 %379  ;;  %v423_v60 = vmul.f32 %v386_v51, %v386_v51 }
 0x22c   : > { %v383_v52 = vsel %vm381_vm0, %v378_v45, %v380_v46 }
 0x22d   : > { %v387_v57 = vsub.f32 %v370_v40, %v383_v52 }
 0x22f   : > { %v412_v50 = vpop.permute.xlu0 %411  ;;  %v414_v54 = vpop.permute.xlu1 %413  ;;  %v424_v1 = vmul.f32 %v387_v57, %v387_v57 }
 0x230   : > { %v417_v55 = vsel %vm381_vm0, %v412_v50, %v414_v54 }
 0x231   : > { %v421_v56 = vadd.f32 %v417_v55, %v405_v53 }
 0x233   : > { %v416_v58 = vpop.permute.xlu0 %415  ;;  %v425_v61 = vmul.f32 %v421_v56, %v421_v56 }
 0x234   : > { %v418_v62 = vsel %vm381_vm0, %v414_v54, %v416_v58 }
 0x235   : > { %v422_v63 = vadd.f32 %v418_v62, %v406_v59  ;;  %v427_v0 = vadd.f32 %v425_v61, %v423_v60 }
 0x237   : > { %v426_v2 = vmul.f32 %v422_v63, %v422_v63  ;;  %584 = vrsqrt.f32 %v427_v0  ;;  %vm431_vm1 = vcmp.eq.f32.partialorder %v427_v0, inf  ;;  %v434_v6 = vand.u32 2147483648, %v427_v0 }
 0x238   : > { %vm433_vm2 = vcmp.eq.f32.partialorder %v427_v0, 0.0 }
 0x239   : > { %v428_v3 = vadd.f32 %v426_v2, %v424_v1 }
 0x23b   : > { %586 = vrsqrt.f32 %v428_v3  ;;  %vm438_vm3 = vcmp.eq.f32.partialorder %v428_v3, inf  ;;  %v441_v13 = vand.u32 2147483648, %v428_v3  ;;  %vm440_vm4 = vcmp.eq.f32.partialorder %v428_v3, 0.0 }
 0x241   : > { %v585_v4 = vpop.eup %584 }
 0x242   : > { %v430_v5 = vmul.f32 %v585_v4, %v427_v0 }
 0x244   : > { %v432_v8 = vsel %vm431_vm1, %v427_v0, %v430_v5 }
 0x245   : > { %v587_v7 = vpop.eup %586  ;;  %v435_v9 = vsel %vm433_vm2, %v434_v6, %v432_v8 }
 0x246   : > { %v437_v10 = vmul.f32 %v587_v7, %v428_v3  ;;  %v443_v12 = vmul.f32 0.33333334, %v435_v9 }
 0x248   : > { %v439_v11 = vsel %vm438_vm3, %v428_v3, %v437_v10  ;;  %445 = vst [vmem:[%s681_s19] sm:$0x1f] %v443_v12 }
 0x249   : > { %v442_v14 = vsel %vm440_vm4, %v441_v13, %v439_v11 }
 0x24a   : > { %v444_v15 = vmul.f32 0.33333334, %v442_v14 }
 0x24c   : > { %446 = vst [vmem:[%s681_s19 + $0x8] sm:$0x1f] %v444_v15 }
 0x24d PF: > { %s11_s10 = sadd.s32 1, %s626_s10   ;;  %s735_s6 = smov %s618_s8 }
 0x24e   : > { %p8_p10 = scmp.ge.s32.totalorder %s11_s10, 10   ;;  %s736_s7 = smov %s622_s9 }
 0x24f   : > { %s737_s8 = smov %s740_s11  ;;  %s738_s9 = smov %s744_s12 }
 0x250   :  { %10 = sbr.rel (!%p8_p10) target bundleno = 3 (0x3), region = 66 }

</bundles_post_ra>
